<compile_context>
chip_gen: v6e
topology: v6e:2x2x1
jax: 0.10.0
libtpu: 0.0.40
codegen_flags: <defaults>
</compile_context>

<pallas_src>
import functools

import jax
import jax.numpy as jnp
from jax.experimental import pallas as pl
from jax.experimental.pallas import tpu as pltpu


def _round_up(n: int, m: int) -> int:
    return (n + m - 1) // m * m


def _cdiv(a: int, b: int) -> int:
    return (a + b - 1) // b


# Probe once whether this jax supports pipeline_mode=pl.Buffered(...)
def _probe_buffered() -> bool:
    try:
        pl.BlockSpec((8, 128), lambda i: (0, 0), pipeline_mode=pl.Buffered(1))
        return True
    except Exception:
        return False


_HAS_BUFFERED = _probe_buffered()


def _resident_spec(shape):
    """BlockSpec for an input whose block never changes (weights/bias): constant
    index_map (never re-fetched) and, when supported, a single VMEM buffer."""
    ndim = len(shape)
    index_map = lambda i: (0,) * ndim
    if _HAS_BUFFERED:
        return pl.BlockSpec(shape, index_map, pipeline_mode=pl.Buffered(1))
    return pl.BlockSpec(shape, index_map)


def _physical_vmem_bytes(default: int = 64 * 1024 * 1024) -> int:
    try:
        info = pltpu.get_tpu_info()
        return int(getattr(info, "vmem_capacity_bytes", default))
    except Exception:
        return default


# --------------------------------- kernel ----------------------------------------


def _augmented_lstm_cell_kernel(x_ref, h_ref, c_ref, wi_ref, ws_ref, b_ref,
                                out_ref, mem_ref, *, hp):
    """Two MXU contractions + gate nonlinearities + highway combine for a batch tile."""
    # [TB, E] @ [E, 6*Hp] and [TB, H] @ [H, 5*Hp], bf16 in, f32 accumulate.
    proj_in = jnp.dot(x_ref[...], wi_ref[...], preferred_element_type=jnp.float32)
    proj_st = jnp.dot(h_ref[...], ws_ref[...], preferred_element_type=jnp.float32)

    proj_in = proj_in + b_ref[...]                    # fused (b_in + b_st) bias, f32
    fused = proj_in[:, :5 * hp] + proj_st             # gate blocks, lane-aligned at g*Hp

    input_gate   = jax.nn.sigmoid(fused[:, 0 * hp:1 * hp])
    forget_gate  = jax.nn.sigmoid(fused[:, 1 * hp:2 * hp])
    memory_init  = jnp.tanh(      fused[:, 2 * hp:3 * hp])
    output_gate  = jax.nn.sigmoid(fused[:, 3 * hp:4 * hp])
    highway_gate = jax.nn.sigmoid(fused[:, 4 * hp:5 * hp])
    highway_inp  = proj_in[:, 5 * hp:6 * hp]

    memory = input_gate * memory_init + forget_gate * c_ref[...]
    ts_out = output_gate * jnp.tanh(memory)
    # hg*ts + (1-hg)*hw  ==  hg*(ts - hw) + hw   (one fewer VPU multiply)
    ts_out = highway_gate * (ts_out - highway_inp) + highway_inp

    out_ref[...] = ts_out.astype(out_ref.dtype)
    mem_ref[...] = memory.astype(mem_ref.dtype)


# -------------------------------- parameter packing ------------------------------


def pack_augmented_lstm_params(w_in, b_in, w_st, b_st, *, lane=128,
                               compute_dtype=jnp.bfloat16):
    """Pack weights/biases ONCE (hoisted off the per-call / per-timestep path).

    w_in: [E, 6H], b_in: [6H], w_st: [H, 5H], b_st: [5H]
    (weights stored transposed relative to torch.nn.Linear).

    Returns (Wi [E, 6*Hp] bf16, Ws [H, 5*Hp] bf16, b [1, 6*Hp] f32) where each gate's
    H columns start at a lane-tile boundary g*Hp.
    """
    E, sixH = w_in.shape
    H = sixH // 6
    Hp = _round_up(H, lane)
    f32 = jnp.float32

    Wi = jnp.zeros((E, 6 * Hp), f32)
    Ws = jnp.zeros((H, 5 * Hp), f32)
    b = jnp.zeros((6 * Hp,), f32)
    for g in range(6):                                   # x contributes to all 6 blocks
        Wi = Wi.at[:, g * Hp:g * Hp + H].set(w_in[:, g * H:(g + 1) * H].astype(f32))
        b = b.at[g * Hp:g * Hp + H].set(b_in[g * H:(g + 1) * H].astype(f32))
    for g in range(5):                                   # h contributes to the 5 gates
        Ws = Ws.at[:, g * Hp:g * Hp + H].set(w_st[:, g * H:(g + 1) * H].astype(f32))
        b = b.at[g * Hp:g * Hp + H].add(b_st[g * H:(g + 1) * H].astype(f32))

    return Wi.astype(compute_dtype), Ws.astype(compute_dtype), b.reshape(1, 6 * Hp)


# ----------------------------------- wrapper --------------------------------------


def _choose_batch_tile(B: int, batch_tile: int) -> int:
    n_tiles = _cdiv(B, batch_tile)
    # v7x megacore: give each of the two TensorCores a tile whenever the batch can be
    # split into two >=16-row tiles (no-op on single-TC v5e/v6e).
    if n_tiles < 2 and B > 16:
        n_tiles = 2
    return _round_up(_cdiv(B, n_tiles), 16)     # bf16 native sublane tiling is (16,128)


def augmented_lstm_cell(x, hidden_state, memory_state, wi_packed, ws_packed, b_packed,
                        *, batch_tile=256, compute_dtype=jnp.bfloat16):
    """Forward pass.  x: [B, E]; hidden/memory: [B, H]; packed params from
    `pack_augmented_lstm_params`.  Returns (timestep_output [B, H], memory [B, H])."""
    B, E = x.shape
    H = hidden_state.shape[1]
    Hp = wi_packed.shape[1] // 6
    out_dtype = x.dtype
    bf = jnp.dtype(compute_dtype).itemsize
    osz = jnp.dtype(out_dtype).itemsize

    # ---- tile sizing + VMEM budget (weights resident, activations double-buffered) --
    weight_bufs = 1 if _HAS_BUFFERED else 2

    def vmem_need(tb):
        return (weight_bufs * (E * 6 * Hp + H * 5 * Hp) * bf   # packed weights
                + 6 * Hp * 4                                   # packed bias
                + 2 * tb * (E + H) * bf                        # x/h tiles (dbl buffered)
                + 2 * tb * Hp * 4                              # c tile (dbl buffered)
                + 2 * 2 * tb * Hp * osz                        # two outputs (dbl buffered)
                + 20 * tb * Hp * 4)                            # proj/gate/memory temporaries

    phys_vmem = _physical_vmem_bytes()          # 64 MiB on v7x, 128 MiB on v5e/v6e
    cap = (phys_vmem * 3) // 4
    TB = _choose_batch_tile(B, batch_tile)
    while vmem_need(TB) > cap and TB > 16:
        TB = max(16, _round_up(TB // 2, 16))
    vmem_limit = int(min(max(int(1.3 * vmem_need(TB)), 32 * 1024 * 1024), cap))

    Bp = TB * _cdiv(B, TB)
    grid = Bp // TB

    # ---- per-call data: only activations are touched (cast + minimal zero padding) --
    xb = x.astype(compute_dtype)
    hb = hidden_state.astype(compute_dtype)
    cf = memory_state.astype(jnp.float32)
    if Bp != B:
        xb = jnp.pad(xb, ((0, Bp - B), (0, 0)))
        hb = jnp.pad(hb, ((0, Bp - B), (0, 0)))
        cf = jnp.pad(cf, ((0, Bp - B), (0, 0)))
    if Hp != H:
        cf = jnp.pad(cf, ((0, 0), (0, Hp - H)))

    kernel = functools.partial(_augmented_lstm_cell_kernel, hp=Hp)

    out_p, mem_p = pl.pallas_call(
        kernel,
        out_shape=(jax.ShapeDtypeStruct((Bp, Hp), out_dtype),
                   jax.ShapeDtypeStruct((Bp, Hp), out_dtype)),
        grid_spec=pltpu.PrefetchScalarGridSpec(
            num_scalar_prefetch=0,
            grid=(grid,),
            in_specs=[
                pl.BlockSpec((TB, E), lambda i: (i, 0)),      # x tile (streamed)
                pl.BlockSpec((TB, H), lambda i: (i, 0)),      # h tile (streamed)
                pl.BlockSpec((TB, Hp), lambda i: (i, 0)),     # c tile (streamed)
                _resident_spec((E, 6 * Hp)),                  # packed W_in (resident)
                _resident_spec((H, 5 * Hp)),                  # packed W_st (resident)
                _resident_spec((1, 6 * Hp)),                  # packed bias (resident)
            ],
            out_specs=[
                pl.BlockSpec((TB, Hp), lambda i: (i, 0)),     # timestep_output
                pl.BlockSpec((TB, Hp), lambda i: (i, 0)),     # memory
            ],
        ),
        compiler_params=pltpu.CompilerParams(
            dimension_semantics=("parallel",),                # megacore shard on v7x
            vmem_limit_bytes=vmem_limit,
        ),
    )(xb, hb, cf, wi_packed, ws_packed, b_packed)

    return out_p[:B, :H], mem_p[:B, :H]


# ----------------------------------- references ------------------------------------


def _reference_f32(x, h, c, w_in, b_in, w_st, b_st):
    """Pure-f32 JAX reference mirroring the PyTorch forward semantics."""
    H = h.shape[1]
    proj_in = x @ w_in + b_in
    proj_st = h @ w_st + b_st
    fused = proj_in[:, :5 * H] + proj_st
    ig, fg, mi, og, hg = jnp.split(fused, 5, axis=1)
    ig = jax.nn.sigmoid(ig); fg = jax.nn.sigmoid(fg)
    mi = jnp.tanh(mi); og = jax.nn.sigmoid(og); hg = jax.nn.sigmoid(hg)
    memory = ig * mi + fg * c
    out = og * jnp.tanh(memory)
    out = hg * out + (1.0 - hg) * proj_in[:, 5 * H:6 * H]
    return out, memory


def _reference_mixed(x, h, c, w_in, b_in, w_st, b_st, dt):
    """Same semantics, matmul inputs quantized to `dt` (mirrors kernel precision)."""
    H = h.shape[1]
    q = lambda a: a.astype(dt)
    proj_in = jnp.dot(q(x), q(w_in), preferred_element_type=jnp.float32) + b_in
    proj_st = jnp.dot(q(h), q(w_st), preferred_element_type=jnp.float32) + b_st
    fused = proj_in[:, :5 * H] + proj_st
    ig, fg, mi, og, hg = jnp.split(fused, 5, axis=1)
    ig = jax.nn.sigmoid(ig); fg = jax.nn.sigmoid(fg)
    mi = jnp.tanh(mi); og = jax.nn.sigmoid(og); hg = jax.nn.sigmoid(hg)
    memory = ig * mi + fg * c
    out = og * jnp.tanh(memory)
    out = hg * out + (1.0 - hg) * proj_in[:, 5 * H:6 * H]
    return out, memory


def init_params(key, embed_dim, lstm_dim):
    """Deterministic synthetic init mirroring the module's parameter shapes
    (block_orthogonal replaced by scaled normal blocks; forget-bias = 1 as in
    reset_parameters).  Weights stored transposed: [in, out]."""
    k1, k2, k3 = jax.random.split(key, 3)
    w_in = jax.random.normal(k1, (embed_dim, 6 * lstm_dim), jnp.float32) / jnp.sqrt(embed_dim)
    b_in = jax.random.normal(k3, (6 * lstm_dim,), jnp.float32) * 0.01
    w_st = jax.random.normal(k2, (lstm_dim, 5 * lstm_dim), jnp.float32) / jnp.sqrt(lstm_dim)
    b_st = jnp.zeros((5 * lstm_dim,), jnp.float32)
    b_st = b_st.at[lstm_dim:2 * lstm_dim].set(1.0)   # forget-gate bias = 1
    return w_in, b_in, w_st, b_st


if __name__ == "__main__":
    batch, embed_dim, lstm_dim = 8, 32, 32
    key = jax.random.PRNGKey(0)
    kx, kh, kc, kp = jax.random.split(key, 4)

    x = jax.random.normal(kx, (batch, embed_dim), jnp.float32)
    h = jax.random.normal(kh, (batch, lstm_dim), jnp.float32)
    c = jax.random.normal(kc, (batch, lstm_dim), jnp.float32)
    w_in, b_in, w_st, b_st = init_params(kp, embed_dim, lstm_dim)

    # Pack weights ONCE; only activations are processed per call.
    Wi, Ws, bb = pack_augmented_lstm_params(w_in, b_in, w_st, b_st)
    Wi, Ws, bb = jax.block_until_ready((Wi, Ws, bb))

    cell = jax.jit(augmented_lstm_cell)
    out, mem = cell(x, h, c, Wi, Ws, bb)
    out = jax.block_until_ready(out)
    mem = jax.block_until_ready(mem)

    # Tight check against a precision-matched (bf16 matmul, f32 accumulate) reference.
    ref_out_m, ref_mem_m = _reference_mixed(x, h, c, w_in, b_in, w_st, b_st, jnp.bfloat16)
    assert jnp.allclose(out, ref_out_m, atol=1e-3, rtol=1e-3)
    assert jnp.allclose(mem, ref_mem_m, atol=1e-3, rtol=1e-3)

    # Loose check against the pure-f32 PyTorch-semantics reference.
    ref_out, ref_mem = _reference_f32(x, h, c, w_in, b_in, w_st, b_st)
    assert jnp.allclose(out, ref_out, atol=1e-1, rtol=5e-2)
    assert jnp.allclose(mem, ref_mem, atol=1e-1, rtol=5e-2)

    print("KERNEL_OK")
</pallas_src>

<mosaic_0001>
module attributes {stable_mosaic.version = 11 : i64} {
  func.func @_augmented_lstm_cell_kernel(%arg0: i32, %arg1: memref<16x32xbf16, #tpu.memory_space<vmem>>, %arg2: memref<16x32xbf16, #tpu.memory_space<vmem>>, %arg3: memref<16x128xf32, #tpu.memory_space<vmem>>, %arg4: memref<32x768xbf16, #tpu.memory_space<vmem>>, %arg5: memref<32x640xbf16, #tpu.memory_space<vmem>>, %arg6: memref<1x768xf32, #tpu.memory_space<vmem>>, %arg7: memref<16x128xf32, #tpu.memory_space<vmem>>, %arg8: memref<16x128xf32, #tpu.memory_space<vmem>>) attributes {dimension_semantics = [#tpu.dimension_semantics<parallel>], iteration_bounds = array<i64: 1>, scalar_prefetch = 0 : i64, scratch_operands = 0 : i64, tpu.core_type = #tpu.core_type<tc>, window_params = [{transform_indices = @transform_0, window_bounds = array<i64: 16, 32>}, {transform_indices = @transform_1, window_bounds = array<i64: 16, 32>}, {transform_indices = @transform_2, window_bounds = array<i64: 16, 128>}, {pipeline_mode = #tpu.pipeline_mode<synchronous>, transform_indices = @transform_3, window_bounds = array<i64: 32, 768>}, {pipeline_mode = #tpu.pipeline_mode<synchronous>, transform_indices = @transform_4, window_bounds = array<i64: 32, 640>}, {pipeline_mode = #tpu.pipeline_mode<synchronous>, transform_indices = @transform_5, window_bounds = array<i64: 1, 768>}, {transform_indices = @transform_6, window_bounds = array<i64: 16, 128>}, {transform_indices = @transform_7, window_bounds = array<i64: 16, 128>}]} {
    %c0 = arith.constant 0 : index
    %c0_0 = arith.constant 0 : index
    %0 = vector.load %arg1[%c0, %c0_0] : memref<16x32xbf16, #tpu.memory_space<vmem>>, vector<16x32xbf16>
    %c0_1 = arith.constant 0 : index
    %c0_2 = arith.constant 0 : index
    %1 = vector.load %arg4[%c0_1, %c0_2] : memref<32x768xbf16, #tpu.memory_space<vmem>>, vector<32x768xbf16>
    %cst = arith.constant dense<0.000000e+00> : vector<16x768xf32>
    %2 = tpu.matmul %0, %1, %cst {dimension_numbers = #tpu.dot_dimension_numbers<[1], [0], [0], [1], [0, 0, 1, 1], [], []>} : vector<16x32xbf16>, vector<32x768xbf16>, vector<16x768xf32> -> vector<16x768xf32>
    %c0_3 = arith.constant 0 : index
    %c0_4 = arith.constant 0 : index
    %3 = vector.load %arg2[%c0_3, %c0_4] : memref<16x32xbf16, #tpu.memory_space<vmem>>, vector<16x32xbf16>
    %c0_5 = arith.constant 0 : index
    %c0_6 = arith.constant 0 : index
    %4 = vector.load %arg5[%c0_5, %c0_6] : memref<32x640xbf16, #tpu.memory_space<vmem>>, vector<32x640xbf16>
    %cst_7 = arith.constant dense<0.000000e+00> : vector<16x640xf32>
    %5 = tpu.matmul %3, %4, %cst_7 {dimension_numbers = #tpu.dot_dimension_numbers<[1], [0], [0], [1], [0, 0, 1, 1], [], []>} : vector<16x32xbf16>, vector<32x640xbf16>, vector<16x640xf32> -> vector<16x640xf32>
    %c0_8 = arith.constant 0 : index
    %c0_9 = arith.constant 0 : index
    %6 = vector.load %arg6[%c0_8, %c0_9] : memref<1x768xf32, #tpu.memory_space<vmem>>, vector<1x768xf32>
    %7 = vector.broadcast %6 : vector<1x768xf32> to vector<16x768xf32>
    %8 = arith.addf %2, %7 : vector<16x768xf32>
    %9 = vector.extract_strided_slice %8 {offsets = [0, 0], sizes = [16, 640], strides = [1, 1]} : vector<16x768xf32> to vector<16x640xf32>
    %10 = arith.addf %9, %5 : vector<16x640xf32>
    %11 = vector.extract_strided_slice %10 {offsets = [0, 0], sizes = [16, 128], strides = [1, 1]} : vector<16x640xf32> to vector<16x128xf32>
    %12 = arith.negf %11 : vector<16x128xf32>
    %13 = math.exp %12 : vector<16x128xf32>
    %cst_10 = arith.constant 1.000000e+00 : f32
    %14 = vector.broadcast %cst_10 : f32 to vector<16x128xf32>
    %15 = arith.addf %14, %13 : vector<16x128xf32>
    %16 = arith.divf %14, %15 : vector<16x128xf32>
    %17 = vector.extract_strided_slice %10 {offsets = [0, 128], sizes = [16, 128], strides = [1, 1]} : vector<16x640xf32> to vector<16x128xf32>
    %18 = arith.negf %17 : vector<16x128xf32>
    %19 = math.exp %18 : vector<16x128xf32>
    %cst_11 = arith.constant 1.000000e+00 : f32
    %20 = vector.broadcast %cst_11 : f32 to vector<16x128xf32>
    %21 = arith.addf %20, %19 : vector<16x128xf32>
    %22 = arith.divf %20, %21 : vector<16x128xf32>
    %23 = vector.extract_strided_slice %10 {offsets = [0, 256], sizes = [16, 128], strides = [1, 1]} : vector<16x640xf32> to vector<16x128xf32>
    %24 = math.tanh %23 : vector<16x128xf32>
    %25 = vector.extract_strided_slice %10 {offsets = [0, 384], sizes = [16, 128], strides = [1, 1]} : vector<16x640xf32> to vector<16x128xf32>
    %26 = arith.negf %25 : vector<16x128xf32>
    %27 = math.exp %26 : vector<16x128xf32>
    %cst_12 = arith.constant 1.000000e+00 : f32
    %28 = vector.broadcast %cst_12 : f32 to vector<16x128xf32>
    %29 = arith.addf %28, %27 : vector<16x128xf32>
    %30 = arith.divf %28, %29 : vector<16x128xf32>
    %31 = vector.extract_strided_slice %10 {offsets = [0, 512], sizes = [16, 128], strides = [1, 1]} : vector<16x640xf32> to vector<16x128xf32>
    %32 = arith.negf %31 : vector<16x128xf32>
    %33 = math.exp %32 : vector<16x128xf32>
    %cst_13 = arith.constant 1.000000e+00 : f32
    %34 = vector.broadcast %cst_13 : f32 to vector<16x128xf32>
    %35 = arith.addf %34, %33 : vector<16x128xf32>
    %36 = arith.divf %34, %35 : vector<16x128xf32>
    %37 = vector.extract_strided_slice %8 {offsets = [0, 640], sizes = [16, 128], strides = [1, 1]} : vector<16x768xf32> to vector<16x128xf32>
    %38 = arith.mulf %16, %24 : vector<16x128xf32>
    %c0_14 = arith.constant 0 : index
    %c0_15 = arith.constant 0 : index
    %39 = vector.load %arg3[%c0_14, %c0_15] : memref<16x128xf32, #tpu.memory_space<vmem>>, vector<16x128xf32>
    %40 = arith.mulf %22, %39 : vector<16x128xf32>
    %41 = arith.addf %38, %40 : vector<16x128xf32>
    %42 = math.tanh %41 : vector<16x128xf32>
    %43 = arith.mulf %30, %42 : vector<16x128xf32>
    %44 = arith.subf %43, %37 : vector<16x128xf32>
    %45 = arith.mulf %36, %44 : vector<16x128xf32>
    %46 = arith.addf %45, %37 : vector<16x128xf32>
    %c0_16 = arith.constant 0 : index
    %c0_17 = arith.constant 0 : index
    %47 = vector.load %arg7[%c0_16, %c0_17] : memref<16x128xf32, #tpu.memory_space<vmem>>, vector<16x128xf32>
    tpu.vector_store %arg7[%c0_16, %c0_17], %46 {strides = array<i32>} : memref<16x128xf32, #tpu.memory_space<vmem>>, vector<16x128xf32>,
    %c0_18 = arith.constant 0 : index
    %c0_19 = arith.constant 0 : index
    %48 = vector.load %arg8[%c0_18, %c0_19] : memref<16x128xf32, #tpu.memory_space<vmem>>, vector<16x128xf32>
    tpu.vector_store %arg8[%c0_18, %c0_19], %41 {strides = array<i32>} : memref<16x128xf32, #tpu.memory_space<vmem>>, vector<16x128xf32>,
    return
  }
  func.func @transform_0(%arg0: i32) -> (i32, i32) {
    %c0_i32 = arith.constant 0 : i32
    %c0_i32_0 = arith.constant 0 : i32
    return %arg0, %c0_i32 : i32, i32
  }
  func.func @transform_1(%arg0: i32) -> (i32, i32) {
    %c0_i32 = arith.constant 0 : i32
    %c0_i32_0 = arith.constant 0 : i32
    return %arg0, %c0_i32 : i32, i32
  }
  func.func @transform_2(%arg0: i32) -> (i32, i32) {
    %c0_i32 = arith.constant 0 : i32
    %c0_i32_0 = arith.constant 0 : i32
    return %arg0, %c0_i32 : i32, i32
  }
  func.func @transform_3(%arg0: i32) -> (i32, i32) {
    %c0_i32 = arith.constant 0 : i32
    %c0_i32_0 = arith.constant 0 : i32
    %c0_i32_1 = arith.constant 0 : i32
    return %c0_i32, %c0_i32_0 : i32, i32
  }
  func.func @transform_4(%arg0: i32) -> (i32, i32) {
    %c0_i32 = arith.constant 0 : i32
    %c0_i32_0 = arith.constant 0 : i32
    %c0_i32_1 = arith.constant 0 : i32
    return %c0_i32, %c0_i32_0 : i32, i32
  }
  func.func @transform_5(%arg0: i32) -> (i32, i32) {
    %c0_i32 = arith.constant 0 : i32
    %c0_i32_0 = arith.constant 0 : i32
    %c0_i32_1 = arith.constant 0 : i32
    return %c0_i32, %c0_i32_0 : i32, i32
  }
  func.func @transform_6(%arg0: i32) -> (i32, i32) {
    %c0_i32 = arith.constant 0 : i32
    %c0_i32_0 = arith.constant 0 : i32
    return %arg0, %c0_i32 : i32, i32
  }
  func.func @transform_7(%arg0: i32) -> (i32, i32) {
    %c0_i32 = arith.constant 0 : i32
    %c0_i32_0 = arith.constant 0 : i32
    return %arg0, %c0_i32 : i32, i32
  }
}

</mosaic_0001>

<bundles_post_ra>
// kernel: augmented_lstm_cell.1
= control target key start
LH: loop header
LB: loop body
LE: loop exit
PB: predicated region body
PF: predicated region fallthrough
CT: control target
= control target key end

     0   :  { %13 = vsyncpa [#allocation3], 0  ;;  %s898_s0 = inlined_call_operand.vmem [shape: bf16[16,32], index: 0, kind: input, shape index: {}]   ;;  %s899_s1 = inlined_call_operand.vmem [shape: bf16[16,32], index: 1, kind: input, shape index: {}]   ;;  %s900_s2 = inlined_call_operand.vmem [shape: f32[16,128], index: 2, kind: input, shape index: {}]   ;;  %s901_s3 = inlined_call_operand.hbm [shape: bf16[32,768], index: 3, kind: input, shape index: {}]   ;;  %s902_s4 = inlined_call_operand.vmem [shape: bf16[32,640], index: 4, kind: input, shape index: {}]   ;;  %s903_s5 = inlined_call_operand.hbm [shape: f32[1,768], index: 5, kind: input, shape index: {}]   ;;  %s904_s6 = inlined_call_operand.vmem [shape: f32[16,128], index: 6, kind: output, shape index: {0}]   ;;  %s905_s7 = inlined_call_operand.vmem [shape: f32[16,128], index: 7, kind: output, shape index: {1}]  }
   0x1   :  { %14 = vsyncpa [#allocation5], 0  ;;  %s763_s24 = smov [#allocation2]  }
   0x2   :  { %s26_s25 = sshll.u32 %s763_s24, 4  ;;  %s27_s25 = int_to_ptr.vmem [resolvable:$true] %s26_s25 }
   0x3   :  { %s727_s26 = scalar_lea.vmem %s27_s25, 1536  ;;  %p732_p1 = scmp.lt.s32.totalorder %s27_s25, %s27_s25 }
   0x4   :  { %p728_p0 = scmp.ne.s32.totalorder %s27_s25, %s727_s26  ;;  %p733_p2 = scmp.lt.s32.totalorder %s727_s26, %s727_s26 }
   0x6   :  { %p734_p3 = por %p733_p2, %p732_p1 }
   0x8   :  { %p735_p4 = pnand %p734_p3, %p728_p0 }
   0xa   :  { %738 = shalt.err (!%p735_p4)
}
   0xb   :  { %s764_s27 = smov 384   ;;  %s765_s28 = smov 24  }
   0xc   :  { %32 = dma.hbm_to_vmem [thread:$0]  %s901_s3, 1536, %s27_s25, [#allocation3], %s764_s27, %s764_s27, %s765_s28  }
   0xd   :  { %s766_s8 = smov [#allocation4]  }
   0xe   :  { %s41_s9 = sshll.u32 %s766_s8, 4  ;;  %s42_s9 = int_to_ptr.vmem [resolvable:$true] %s41_s9 }
   0xf   :  { %s747_s10 = scalar_lea.vmem %s42_s9, 96  ;;  %p752_p6 = scmp.lt.s32.totalorder %s42_s9, %s42_s9 }
  0x10   :  { %p748_p5 = scmp.ne.s32.totalorder %s42_s9, %s747_s10  ;;  %p753_p7 = scmp.lt.s32.totalorder %s747_s10, %s747_s10 }
  0x12   :  { %p754_p8 = por %p753_p7, %p752_p6 }
  0x14   :  { %p755_p9 = pnand %p754_p8, %p748_p5 }
  0x16   :  { %758 = shalt.err (!%p755_p9)
}
  0x17   :  { %44 = dma.hbm_to_vmem [thread:$0]  %s903_s5, 96, %s42_s9, [#allocation5]  }
  0x18   :  { %759 = dma.done.wait [#allocation3], 1536  }
  0x19   :  { %760 = vsyncadd [#allocation3], 4294965760 }
  0x1a   :  { %761 = dma.done.wait [#allocation5], 96  }
  0x1b   :  { %762 = vsyncadd [#allocation5], 4294967200  ;;  %v767_v0 = vmov 0   ;;  %v645_v1 = vld [vmem:[%s902_s4 + $0x2c] ss:$20 sps:$4 sm:$0xff]   ;;  %vm137_vm0 = vcmask 261120   ;;  %v270_v26 = vlaneseq }
  0x1c   :  { %173 = vmatprep.mubr.bf16.mxu0 %v767_v0  ;;  %216 = vmatprep.mubr.bf16.mxu1 %v767_v0  ;;  %v647_v2 = vld [vmem:[%s902_s4 + $0x34] ss:$20 sps:$4 sm:$0xff]   ;;  %v650_v4 = vld [vmem:[%s902_s4 + $0x30] ss:$20 sps:$4 sm:$0xff]   ;;  %v653_v6 = vld [vmem:[%s902_s4 + $0xc] ss:$20 sps:$4 sm:$0xff]  }
  0x1d   :  { %153 = vmatprep.subr.bf16.mxu0 %v645_v1  ;;  %v649_v3 = vld [vmem:[%s902_s4 + $0x28] ss:$20 sps:$4 sm:$0xff]   ;;  %196 = vmatprep.subr.bf16.mxu1 %v647_v2  ;;  %v651_v5 = vld [vmem:[%s902_s4 + $0x4] ss:$20 sps:$4 sm:$0xff]   ;;  %v655_v7 = vld [vmem:[%s902_s4] ss:$20 sps:$4 sm:$0xff]  }
  0x1e   :  { %154 = vmatpush1.bf16.msra.mxu0 %v649_v3  ;;  %197 = vmatpush1.bf16.msra.mxu1 %v650_v4  ;;  %v656_v8 = vld [vmem:[%s902_s4 + $0x8] ss:$20 sps:$4 sm:$0xff]   ;;  %v657_v9 = vld [vmem:[%s899_s1] sm:$0xff]   ;;  %v660_v11 = vld [vmem:[#allocation2 + $0x34] ss:$24 sps:$4 sm:$0xff]   ;;  %v768_v13 = vmov 0.0  }
  0x1f   :  { %155 = vmatprep.subr.bf16.mxu0 %v651_v5  ;;  %198 = vmatprep.subr.bf16.mxu1 %v653_v6  ;;  %v658_v10 = vld [vmem:[#allocation2 + $0x30] ss:$24 sps:$4 sm:$0xff]   ;;  %v661_v12 = vld [vmem:[%s902_s4 + $0x38] ss:$20 sps:$4 sm:$0xff]   ;;  %v664_v14 = vld [vmem:[#allocation2 + $0x4] ss:$24 sps:$4 sm:$0xff]  }
  0x20   :  { %v662_v15 = vld [vmem:[#allocation2] ss:$24 sps:$4 sm:$0xff]   ;;  %v665_v16 = vld [vmem:[%s902_s4 + $0x10] ss:$20 sps:$4 sm:$0xff]   ;;  %v669_v17 = vld [vmem:[#allocation2 + $0x3c] ss:$24 sps:$4 sm:$0xff]  }
  0x21   :  { %vm769_vm1 = vmmov 0   ;;  %v672_v18 = vld [vmem:[#allocation2 + $0x44] ss:$24 sps:$4 sm:$0xff]   ;;  %v667_v20 = vld [vmem:[#allocation2 + $0x38] ss:$24 sps:$4 sm:$0xff]   ;;  %v858_v27 = vshrl.u32 %v270_v26, 7 }
  0x22   :  { %156 = vmatpush1.bf16.msra.mxu0 %v655_v7  ;;  %199 = vmatpush1.bf16.msra.mxu1 %v656_v8  ;;  %v666_v19 = vld [vmem:[%s898_s0] sm:$0xff]   ;;  %v678_v23 = vld [vmem:[#allocation2 + $0x14] ss:$24 sps:$4 sm:$0xff]   ;;  %v676_v25 = vld [vmem:[#allocation2 + $0x10] ss:$24 sps:$4 sm:$0xff]  }
  0x23   :  { %630 = vmatprep.subr.bf16.mxu0 %v768_v13  ;;  %380 = vmatprep.subr.bf16.mxu1 %v660_v11  ;;  %v670_v21 = vld [vmem:[#allocation2 + $0x40] ss:$24 sps:$4 sm:$0xff]   ;;  %v675_v22 = vld [vmem:[#allocation2 + $0xc] ss:$24 sps:$4 sm:$0xff]   ;;  %v272_v30 = vsub.s32 0, %v858_v27  ;;  %v276_v34 = vsub.s32 1, %v858_v27 }
  0x24   :  { %v673_v24 = vld [vmem:[#allocation2 + $0x8] ss:$24 sps:$4 sm:$0xff]   ;;  %v284_v46 = vsub.s32 3, %v858_v27  ;;  %v288_v51 = vsub.s32 4, %v858_v27  ;;  %v280_v55 = vsub.s32 2, %v858_v27 }
  0x25   :  { %600 = vmatmul.mubr.msk.bf16.vlgmr.msra.gmra.mxu0 %vm137_vm0, %v657_v9  ;;  %601 = vmatmul.mubr.msk.bf16.vlgmr.msra.gmra.mxu1 %vm137_vm0, %v657_v9  ;;  %v861_v33 = vld [vmem:[#allocation4] sm:$0x3f] }
  0x26   :  { %631 = vmatpush3.bf16.msra.mxu0 %v661_v12  ;;  %381 = vmatpush1.bf16.msra.mxu1 %v658_v10  ;;  %v273_v37 = vrot.slane %v861_v33, %v272_v30  ;;  %v277_v40 = vrot.slane %v861_v33, %v276_v34  ;;  %v285_v58 = vrot.slane %v861_v33, %v284_v46 }
  0x27   :  { %632 = vmatprep.subr.bf16.mxu0 %v768_v13  ;;  %382 = vmatprep.subr.bf16.mxu1 %v664_v14  ;;  %v289_v63 = vrot.slane %v861_v33, %v288_v51  ;;  %v281_v3 = vrot.slane %v861_v33, %v280_v55 }
  0x28   :  { %634 = vmatprep.mubr.msk.bf16.mxu0 %vm769_vm1, %v768_v13  ;;  %400 = vmatprep.mubr.bf16.mxu1 %v767_v0 }
  0x2a   :  { %633 = vmatpush3.bf16.msra.mxu0 %v665_v16  ;;  %383 = vmatpush1.bf16.msra.mxu1 %v662_v15 }
  0x2b   :  { %423 = vmatprep.subr.bf16.mxu0 %v669_v17  ;;  %466 = vmatprep.subr.bf16.mxu1 %v672_v18 }
  0x2d   :  { %635 = vmatmul.mubr.msk.bf16.vlgmr.msra.gmra.mxu0 %vm137_vm0, %v657_v9  ;;  %616 = vmatmul.mubr.msk.bf16.vlgmr.msra.gmra.mxu1 %vm137_vm0, %v666_v19 }
  0x2e   :  { %424 = vmatpush1.bf16.msra.mxu0 %v667_v20  ;;  %467 = vmatpush1.bf16.msra.mxu1 %v670_v21 }
  0x2f   :  { %425 = vmatprep.subr.bf16.mxu0 %v675_v22  ;;  %468 = vmatprep.subr.bf16.mxu1 %v678_v23 }
  0x30   :  { %443 = vmatprep.mubr.bf16.mxu0 %v767_v0  ;;  %486 = vmatprep.mubr.bf16.mxu1 %v767_v0 }
  0x32   :  { %426 = vmatpush1.bf16.msra.mxu0 %v673_v24  ;;  %469 = vmatpush1.bf16.msra.mxu1 %v676_v25 }
  0x35   :  { %617 = vmatmul.mubr.msk.bf16.vlgmr.msra.gmra.mxu0 %vm137_vm0, %v666_v19  ;;  %618 = vmatmul.mubr.msk.bf16.vlgmr.msra.gmra.mxu1 %vm137_vm0, %v666_v19 }
  0xe5   :  { %v175_v28 = vpop.f32.mrf.mxu0  ;;  %v218_v29 = vpop.f32.mrf.mxu1 }
  0xe7   :  { %v177_v31 = vpop.f32.mrf.mxu0  ;;  %v220_v32 = vpop.f32.mrf.mxu1 }
  0xe9   :  { %v179_v35 = vpop.f32.mrf.mxu0  ;;  %v864_v36 = vpop.f32.mrf.mxu1 }
  0xeb   :  { %v181_v38 = vpop.f32.mrf.mxu0  ;;  %v224_v39 = vpop.f32.mrf.mxu1 }
  0xed   :  { %v261_v41 = vpop.f32.mrf.mxu0  ;;  %v402_v42 = vpop.f32.mrf.mxu1 }
  0xee   :  { %v403_v43 = vadd.f32 %v402_v42, %v273_v37 }
  0xef   :  { %v636_v44 = vpop.f32.mrf.mxu0  ;;  %v404_v45 = vpop.f32.mrf.mxu1 }
  0xf0   :  { %v497_v47 = vadd.f32 %v403_v43, %v175_v28  ;;  %v405_v48 = vadd.f32 %v404_v45, %v277_v40 }
  0xf1   :  { %v264_v49 = vpop.f32.mrf.mxu0  ;;  %v406_v50 = vpop.f32.mrf.mxu1 }
  0xf2   :  { %v619_v52 = vmul.f32 -1.442695, %v497_v47  ;;  %v498_v53 = vadd.f32 %v405_v48, %v177_v31  ;;  %v407_v54 = vadd.f32 %v406_v50, %v273_v37  ;;  %v560_v47 = vld [vmem:[%s900_s2 + $0x8] sm:$0xff] }
  0xf3   :  { %v637_v56 = vpop.f32.mrf.mxu0  ;;  %v408_v57 = vpop.f32.mrf.mxu1 }
  0xf4   :  { %679 = vpow2.f32 %v619_v52  ;;  %v621_v59 = vmul.f32 -1.442695, %v498_v53  ;;  %v502_v60 = vadd.f32 %v407_v54, %v179_v35  ;;  %v409_v61 = vadd.f32 %v408_v57, %v277_v40  ;;  %v559_v40 = vld [vmem:[%s900_s2] sm:$0xff] }
  0xf5   :  { %v445_v62 = vpop.f32.mrf.mxu0  ;;  %v488_v0 = vpop.f32.mrf.mxu1 }
  0xf6   :  { %681 = vpow2.f32 %v621_v59  ;;  %v620_v1 = vmul.f32 -1.442695, %v502_v60  ;;  %v503_v2 = vadd.f32 %v409_v61, %v181_v38  ;;  %v489_v7 = vadd.f32 %v488_v0, %v289_v63 }
  0xf7   :  { %v447_v4 = vpop.f32.mrf.mxu0  ;;  %v874_v8 = vpop.f32.mrf.mxu1  ;;  %v446_v10 = vadd.f32 %v445_v62, %v281_v3 }
  0xf8   :  { %683 = vpow2.f32 %v620_v1  ;;  %v622_v5 = vmul.f32 -1.442695, %v503_v2  ;;  %v448_v6 = vadd.f32 %v447_v4, %v285_v58  ;;  %v501_v14 = vadd.f32 %v489_v7, %v261_v41 }
  0xf9   :  { %v449_v9 = vpop.f32.mrf.mxu0  ;;  %v492_v15 = vpop.f32.mrf.mxu1  ;;  %v499_v16 = vadd.f32 %v446_v10, %v218_v29 }
  0xfa   :  { %685 = vpow2.f32 %v622_v5  ;;  %v500_v11 = vadd.f32 %v448_v6, %v220_v32  ;;  %v493_v19 = vadd.f32 %v492_v15, %v289_v63  ;;  %v625_v21 = vmul.f32 -1.442695, %v501_v14 }
  0xfb   :  { %v451_v12 = vpop.f32.mrf.mxu0  ;;  %v450_v22 = vadd.f32 %v449_v9, %v281_v3  ;;  %687 = vtanh.f32 %v499_v16  ;;  %v494_v1 = vpop.f32.mrf.mxu1 }
  0xfc   :  { %v452_v13 = vadd.f32 %v451_v12, %v285_v58  ;;  %v623_v17 = vmul.f32 -1.442695, %v500_v11  ;;  %v506_v28 = vadd.f32 %v493_v19, %v264_v49  ;;  %v292_v58 = vsub.s32 5, %v858_v27 }
  0xfd   :  { %v504_v31 = vadd.f32 %v450_v22, %v864_v36 }
  0xfe   :  { %v505_v18 = vadd.f32 %v452_v13, %v224_v39  ;;  %689 = vpow2.f32 %v623_v17  ;;  %v626_v35 = vmul.f32 -1.442695, %v506_v28  ;;  %v293_v59 = vrot.slane %v861_v33, %v292_v58 }
 0x100   :  { %v624_v25 = vmul.f32 -1.442695, %v505_v18  ;;  %v491_v62 = vadd.f32 %v874_v8, %v293_v59  ;;  %v495_v6 = vadd.f32 %v494_v1, %v293_v59 }
 0x101   :  { %v680_v20 = vpop.eup %679 }
 0x102   :  { %v513_v23 = vadd.f32 1.0, %v680_v20 }
 0x103   :  { %v682_v24 = vpop.eup %681 }
 0x104   :  { %691 = vrcp.f32 %v513_v23  ;;  %v525_v26 = vadd.f32 1.0, %v682_v24 }
 0x105   :  { %v684_v30 = vpop.eup %683  ;;  %693 = vpow2.f32 %v625_v21 }
 0x106   :  { %695 = vrcp.f32 %v525_v26  ;;  %v514_v29 = vadd.f32 1.0, %v684_v30 }
 0x107   :  { %v686_v32 = vpop.eup %685  ;;  %697 = vpow2.f32 %v624_v25 }
 0x108   :  { %699 = vrcp.f32 %v514_v29  ;;  %v526_v34 = vadd.f32 1.0, %v686_v32  ;;  %v688_v37 = vpop.eup %687 }
 0x109   :  { %701 = vtanh.f32 %v504_v31 }
 0x10a   :  { %703 = vrcp.f32 %v526_v34 }
 0x10b   :  { %705 = vpow2.f32 %v626_v35  ;;  %v690_v38 = vpop.eup %689 }
 0x10c   :  { %v539_v36 = vadd.f32 1.0, %v690_v38 }
 0x10e   :  { %707 = vrcp.f32 %v539_v36 }
 0x111   :  { %v692_v39 = vpop.eup %691 }
 0x112   :  { %v694_v41 = vpop.eup %693  ;;  %v557_v44 = vmul.f32 %v692_v39, %v688_v37 }
 0x113   :  { %v696_v42 = vpop.eup %695  ;;  %v551_v50 = vadd.f32 1.0, %v694_v41 }
 0x114   :  { %v698_v43 = vpop.eup %697  ;;  %v561_v45 = vmul.f32 %v696_v42, %v559_v40 }
 0x115   :  { %v700_v46 = vpop.eup %699  ;;  %v540_v52 = vadd.f32 1.0, %v698_v43 }
 0x116   :  { %v702_v48 = vpop.eup %701  ;;  %v563_v49 = vadd.f32 %v561_v45, %v557_v44 }
 0x117   :  { %v704_v51 = vpop.eup %703  ;;  %v558_v53 = vmul.f32 %v702_v48, %v700_v46 }
 0x118   :  { %577 = vst [vmem:[%s905_s7] sm:$0xff] %v563_v49  ;;  %709 = vtanh.f32 %v563_v49  ;;  %v562_v54 = vmul.f32 %v704_v51, %v560_v47  ;;  %v706_v55 = vpop.eup %705 }
 0x119   :  { %711 = vrcp.f32 %v551_v50  ;;  %v552_v57 = vadd.f32 1.0, %v706_v55 }
 0x11a   :  { %v564_v56 = vadd.f32 %v562_v54, %v558_v53  ;;  %713 = vrcp.f32 %v540_v52 }
 0x11b   :  { %v708_v60 = vpop.eup %707 }
 0x11c   :  { %578 = vst [vmem:[%s905_s7 + $0x8] sm:$0xff] %v564_v56  ;;  %715 = vtanh.f32 %v564_v56 }
 0x11d   :  { %717 = vrcp.f32 %v552_v57 }
 0x125   :  { %v710_v61 = vpop.eup %709 }
 0x126   :  { %v567_v63 = vmul.f32 %v710_v61, %v708_v60  ;;  %v712_v0 = vpop.eup %711 }
 0x127   :  { %v714_v2 = vpop.eup %713 }
 0x128   :  { %v569_v3 = vsub.f32 %v567_v63, %v491_v62 }
 0x129   :  { %v716_v4 = vpop.eup %715 }
 0x12a   :  { %v571_v5 = vmul.f32 %v712_v0, %v569_v3  ;;  %v568_v7 = vmul.f32 %v716_v4, %v714_v2  ;;  %v718_v11 = vpop.eup %717 }
 0x12c   :  { %v573_v9 = vadd.f32 %v571_v5, %v491_v62  ;;  %v570_v10 = vsub.f32 %v568_v7, %v495_v6 }
 0x12e   :  { %575 = vst [vmem:[%s904_s6] sm:$0xff] %v573_v9  ;;  %v572_v27 = vmul.f32 %v718_v11, %v570_v10 }
 0x130   :  { %v574_v33 = vadd.f32 %v572_v27, %v495_v6 }
 0x132   :  { %576 = vst [vmem:[%s904_s6 + $0x8] sm:$0xff] %v574_v33 }
 0x133   :  { %587 = vsyncpa [#allocation3], 1 }
 0x134   :  { %588 = vsyncpa [#allocation5], 1 }

</bundles_post_ra>
